<compile_context>
chip_gen: v5e
topology: v5e:2x2
jax: 0.10.0
libtpu: 0.0.40
codegen_flags: <defaults>
</compile_context>

<pallas_src>
import functools

import jax
import jax.numpy as jnp
from jax import lax
from jax.experimental import pallas as pl
from jax.experimental.pallas import tpu as pltpu


def _round_up(x, m):
    return ((x + m - 1) // m) * m


def _center_loss_kernel(x_ref, labels_ref, c_ref, out_ref):
    # x_ref:      (TB, D) float   VMEM — batch tile of features
    # labels_ref: (TB, 1) int32   VMEM — batch tile of labels
    # c_ref:      (C, D)  float   VMEM — full centers table (resident across grid)
    # out_ref:    (TB, 1) float32 VMEM — clamped per-row squared distance
    x = x_ref[...].astype(jnp.float32)                         # (TB, D)
    lbl = labels_ref[...]                                      # (TB, 1) int32
    num_class = c_ref.shape[0]

    # Vectorized gather of centers[labels[i]] via one-hot matmul on the MXU.
    classes = lax.broadcasted_iota(jnp.int32, (x.shape[0], num_class), 1)
    onehot = (lbl == classes).astype(jnp.float32)              # (TB, C)
    gathered = jnp.dot(onehot, c_ref[...].astype(jnp.float32),
                       preferred_element_type=jnp.float32)     # (TB, D)

    diff = x - gathered
    row_sq = jnp.sum(diff * diff, axis=1, keepdims=True)       # (TB, 1)
    # torch clamps the surviving (label) entry of the masked distmat.
    out_ref[...] = jnp.clip(row_sq, 1e-12, 1e12)


def _make_call(x_dtype, c_dtype, block_b, D, C, num_blocks, *,
               single_buffer_centers):
    if single_buffer_centers:
        centers_spec = pl.BlockSpec((C, D), lambda i: (0, 0),
                                    pipeline_mode=pl.Buffered(1))
        n_center_bufs = 1
    else:
        centers_spec = pl.BlockSpec((C, D), lambda i: (0, 0))
        n_center_bufs = 2

    x_item = jnp.dtype(x_dtype).itemsize
    c_item = jnp.dtype(c_dtype).itemsize
    vmem_need = (2 * block_b * D * x_item          # double-buffered x tiles
                 + 2 * block_b * 4                 # double-buffered label tiles
                 + 2 * block_b * 4                 # double-buffered output tiles
                 + n_center_bufs * C * D * c_item) # resident centers
    vmem_limit = int(min(64 * 1024 * 1024, max(2 * vmem_need, 8 * 1024 * 1024)))

    cost = pl.CostEstimate(
        flops=num_blocks * block_b * (2 * C * D + 4 * D),
        transcendentals=0,
        bytes_accessed=(num_blocks * block_b * (D * x_item + 4 + 4)
                        + C * D * c_item),
    )

    return pl.pallas_call(
        _center_loss_kernel,
        out_shape=jax.ShapeDtypeStruct((num_blocks * block_b, 1), jnp.float32),
        grid_spec=pltpu.PrefetchScalarGridSpec(
            num_scalar_prefetch=0,
            grid=(num_blocks,),
            in_specs=[
                pl.BlockSpec((block_b, D), lambda i: (i, 0)),  # x batch tile
                pl.BlockSpec((block_b, 1), lambda i: (i, 0)),  # label batch tile
                centers_spec,                                  # resident centers
            ],
            out_specs=pl.BlockSpec((block_b, 1), lambda i: (i, 0)),
        ),
        compiler_params=pltpu.CompilerParams(
            dimension_semantics=("parallel",),                 # megacore-friendly
            vmem_limit_bytes=vmem_limit),
        cost_estimate=cost,
    )


def center_loss(x, centers, labels, *, block_b=None):
    """x: (B, D) float, centers: (C, D) float, labels: (B,) int -> scalar f32."""
    B, D = x.shape
    C, Dc = centers.shape
    assert D == Dc, "feature dims of x and centers must match"
    assert labels.shape[0] == B, "features.size(0) is not equal to labels.size(0)"

    # dtype-aware sublane rounding: 8 rows f32, 16 bf16, 32 int8/fp8.
    x_item = jnp.dtype(x.dtype).itemsize
    sublane = {4: 8, 2: 16, 1: 32}.get(x_item, 8)
    if block_b is None:
        # Large tiles amortize the ~0.35us/step overhead; cap so the double-
        # buffered x stream stays well inside VMEM even for wide features.
        vmem_cap_rows = max(sublane, (8 * 1024 * 1024) // max(1, 2 * D * x_item))
        block_b = min(512, vmem_cap_rows, _round_up(B, sublane))
    block_b = max(sublane, _round_up(block_b, sublane))
    b_pad = _round_up(B, block_b)
    num_blocks = b_pad // block_b

    labels_p = labels.astype(jnp.int32).reshape(B, 1)
    x_p = x
    if b_pad != B:
        x_p = jnp.pad(x, ((0, b_pad - B), (0, 0)))
        labels_p = jnp.pad(labels_p, ((0, b_pad - B), (0, 0)))

    make = functools.partial(_make_call, x_p.dtype, centers.dtype,
                             block_b, D, C, num_blocks)
    try:
        out = make(single_buffer_centers=True)(x_p, labels_p, centers)
        out = jax.block_until_ready(out)
    except Exception:
        # Fallback for JAX builds that reject pipeline_mode=pl.Buffered(1).
        out = make(single_buffer_centers=False)(x_p, labels_p, centers)

    # Padded rows are simply ignored by the slice.  The masked zeros of the
    # reference's (B, C) matrix clamp to 1e-12 and are still summed: add that
    # constant, then divide by B.
    per_row = out[:B, 0]
    floor = jnp.float32(B * (C - 1)) * jnp.float32(1e-12)
    return (jnp.sum(per_row) + floor) / jnp.float32(B)


if __name__ == "__main__":
    # Deterministic synthetic parameters / inputs (no checkpoint loading).
    num_class = 16
    feat_dim = 32
    batch = 8

    key = jax.random.PRNGKey(0)
    k_centers, k_x, k_labels = jax.random.split(key, 3)

    # centers ~ randn(num_class, feat_dim)  (module __init__)
    centers = jax.random.normal(k_centers, (num_class, feat_dim), dtype=jnp.float32)
    x = jax.random.normal(k_x, (batch, feat_dim), dtype=jnp.float32)
    labels = jax.random.randint(k_labels, (batch,), 0, num_class, dtype=jnp.int32)

    loss = center_loss(x, centers, labels)
    jax.block_until_ready(loss)

    # Pure-JAX reference check (same math as the torch module).  Note: the kernel
    # computes ||x - c||^2 directly, the reference uses the x^2 + c^2 - 2xc
    # expansion; agreement is within float tolerance, not bit-exact.
    distmat = (
        jnp.sum(x**2, axis=1, keepdims=True)
        + jnp.sum(centers**2, axis=1)[None, :]
        - 2.0 * x @ centers.T
    )
    mask = (labels[:, None] == jnp.arange(num_class)[None, :]).astype(jnp.float32)
    ref = jnp.sum(jnp.clip(distmat * mask, 1e-12, 1e12)) / batch

    assert jnp.allclose(loss, ref, rtol=1e-5, atol=1e-5), (loss, ref)
    print("KERNEL_OK")
</pallas_src>

<mosaic_0001>
module attributes {stable_mosaic.version = 11 : i64} {
  func.func @_center_loss_kernel(%arg0: i32, %arg1: memref<8x32xf32, #tpu.memory_space<vmem>>, %arg2: memref<8x1xi32, #tpu.memory_space<vmem>>, %arg3: memref<16x32xf32, #tpu.memory_space<vmem>>, %arg4: memref<8x1xf32, #tpu.memory_space<vmem>>) attributes {dimension_semantics = [#tpu.dimension_semantics<parallel>], iteration_bounds = array<i64: 1>, scalar_prefetch = 0 : i64, scratch_operands = 0 : i64, tpu.core_type = #tpu.core_type<tc>, window_params = [{transform_indices = @transform_0, window_bounds = array<i64: 8, 32>}, {transform_indices = @transform_1, window_bounds = array<i64: 8, 1>}, {pipeline_mode = #tpu.pipeline_mode<synchronous>, transform_indices = @transform_2, window_bounds = array<i64: 16, 32>}, {transform_indices = @transform_3, window_bounds = array<i64: 8, 1>}]} {
    %c0 = arith.constant 0 : index
    %c0_0 = arith.constant 0 : index
    %0 = vector.load %arg1[%c0, %c0_0] : memref<8x32xf32, #tpu.memory_space<vmem>>, vector<8x32xf32>
    %c0_1 = arith.constant 0 : index
    %c0_2 = arith.constant 0 : index
    %1 = vector.load %arg2[%c0_1, %c0_2] : memref<8x1xi32, #tpu.memory_space<vmem>>, vector<8x1xi32>
    %2 = tpu.iota {dimensions = array<i32: 1>} : vector<8x16xi32>
    %3 = vector.broadcast %1 : vector<8x1xi32> to vector<8x16xi32>
    %4 = arith.cmpi eq, %3, %2 : vector<8x16xi32>
    %5 = arith.extui %4 : vector<8x16xi1> to vector<8x16xi32>
    %6 = arith.sitofp %5 : vector<8x16xi32> to vector<8x16xf32>
    %c0_3 = arith.constant 0 : index
    %c0_4 = arith.constant 0 : index
    %7 = vector.load %arg3[%c0_3, %c0_4] : memref<16x32xf32, #tpu.memory_space<vmem>>, vector<16x32xf32>
    %cst = arith.constant dense<0.000000e+00> : vector<8x32xf32>
    %8 = tpu.matmul %6, %7, %cst {dimension_numbers = #tpu.dot_dimension_numbers<[1], [0], [0], [1], [0, 0, 1, 1], [], []>} : vector<8x16xf32>, vector<16x32xf32>, vector<8x32xf32> -> vector<8x32xf32>
    %9 = arith.subf %0, %8 : vector<8x32xf32>
    %10 = arith.mulf %9, %9 : vector<8x32xf32>
    %cst_5 = arith.constant dense<0.000000e+00> : vector<8xf32>
    %11 = vector.multi_reduction <add>, %10, %cst_5 [1] : vector<8x32xf32> to vector<8xf32>
    %12 = vector.shape_cast %11 : vector<8xf32> to vector<8x1xf32>
    %cst_6 = arith.constant 9.99999996E-13 : f32
    %cst_7 = arith.constant 9.99999995E+11 : f32
    %13 = vector.broadcast %cst_6 : f32 to vector<8x1xf32>
    %14 = arith.maximumf %13, %12 : vector<8x1xf32>
    %15 = vector.broadcast %cst_7 : f32 to vector<8x1xf32>
    %16 = arith.minimumf %15, %14 : vector<8x1xf32>
    %c0_8 = arith.constant 0 : index
    %c0_9 = arith.constant 0 : index
    %17 = vector.load %arg4[%c0_8, %c0_9] : memref<8x1xf32, #tpu.memory_space<vmem>>, vector<8x1xf32>
    tpu.vector_store %arg4[%c0_8, %c0_9], %16 {strides = array<i32>} : memref<8x1xf32, #tpu.memory_space<vmem>>, vector<8x1xf32>,
    return
  }
  func.func @transform_0(%arg0: i32) -> (i32, i32) {
    %c0_i32 = arith.constant 0 : i32
    %c0_i32_0 = arith.constant 0 : i32
    return %arg0, %c0_i32 : i32, i32
  }
  func.func @transform_1(%arg0: i32) -> (i32, i32) {
    %c0_i32 = arith.constant 0 : i32
    %c0_i32_0 = arith.constant 0 : i32
    return %arg0, %c0_i32 : i32, i32
  }
  func.func @transform_2(%arg0: i32) -> (i32, i32) {
    %c0_i32 = arith.constant 0 : i32
    %c0_i32_0 = arith.constant 0 : i32
    %c0_i32_1 = arith.constant 0 : i32
    return %c0_i32, %c0_i32_0 : i32, i32
  }
  func.func @transform_3(%arg0: i32) -> (i32, i32) {
    %c0_i32 = arith.constant 0 : i32
    %c0_i32_0 = arith.constant 0 : i32
    return %arg0, %c0_i32 : i32, i32
  }
}

module attributes {stable_mosaic.version = 11 : i64} {
  func.func @_center_loss_kernel(%arg0: i32, %arg1: memref<8x32xf32, #tpu.memory_space<vmem>>, %arg2: memref<8x1xi32, #tpu.memory_space<vmem>>, %arg3: memref<16x32xf32, #tpu.memory_space<vmem>>, %arg4: memref<8x1xf32, #tpu.memory_space<vmem>>) attributes {dimension_semantics = [#tpu.dimension_semantics<parallel>], iteration_bounds = array<i64: 1>, scalar_prefetch = 0 : i64, scratch_operands = 0 : i64, tpu.core_type = #tpu.core_type<tc>, window_params = [{transform_indices = @transform_0, window_bounds = array<i64: 8, 32>}, {transform_indices = @transform_1, window_bounds = array<i64: 8, 1>}, {pipeline_mode = #tpu.pipeline_mode<synchronous>, transform_indices = @transform_2, window_bounds = array<i64: 16, 32>}, {transform_indices = @transform_3, window_bounds = array<i64: 8, 1>}]} {
    %c0 = arith.constant 0 : index
    %c0_0 = arith.constant 0 : index
    %0 = vector.load %arg1[%c0, %c0_0] : memref<8x32xf32, #tpu.memory_space<vmem>>, vector<8x32xf32>
    %c0_1 = arith.constant 0 : index
    %c0_2 = arith.constant 0 : index
    %1 = vector.load %arg2[%c0_1, %c0_2] : memref<8x1xi32, #tpu.memory_space<vmem>>, vector<8x1xi32>
    %2 = tpu.iota {dimensions = array<i32: 1>} : vector<8x16xi32>
    %3 = vector.broadcast %1 : vector<8x1xi32> to vector<8x16xi32>
    %4 = arith.cmpi eq, %3, %2 : vector<8x16xi32>
    %5 = arith.extui %4 : vector<8x16xi1> to vector<8x16xi32>
    %6 = arith.sitofp %5 : vector<8x16xi32> to vector<8x16xf32>
    %c0_3 = arith.constant 0 : index
    %c0_4 = arith.constant 0 : index
    %7 = vector.load %arg3[%c0_3, %c0_4] : memref<16x32xf32, #tpu.memory_space<vmem>>, vector<16x32xf32>
    %cst = arith.constant dense<0.000000e+00> : vector<8x32xf32>
    %8 = tpu.matmul %6, %7, %cst {dimension_numbers = #tpu.dot_dimension_numbers<[1], [0], [0], [1], [0, 0, 1, 1], [], []>} : vector<8x16xf32>, vector<16x32xf32>, vector<8x32xf32> -> vector<8x32xf32>
    %9 = arith.subf %0, %8 : vector<8x32xf32>
    %10 = arith.mulf %9, %9 : vector<8x32xf32>
    %cst_5 = arith.constant dense<0.000000e+00> : vector<8xf32>
    %11 = vector.multi_reduction <add>, %10, %cst_5 [1] : vector<8x32xf32> to vector<8xf32>
    %12 = vector.shape_cast %11 : vector<8xf32> to vector<8x1xf32>
    %cst_6 = arith.constant 9.99999996E-13 : f32
    %cst_7 = arith.constant 9.99999995E+11 : f32
    %13 = vector.broadcast %cst_6 : f32 to vector<8x1xf32>
    %14 = arith.maximumf %13, %12 : vector<8x1xf32>
    %15 = vector.broadcast %cst_7 : f32 to vector<8x1xf32>
    %16 = arith.minimumf %15, %14 : vector<8x1xf32>
    %c0_8 = arith.constant 0 : index
    %c0_9 = arith.constant 0 : index
    %17 = vector.load %arg4[%c0_8, %c0_9] : memref<8x1xf32, #tpu.memory_space<vmem>>, vector<8x1xf32>
    tpu.vector_store %arg4[%c0_8, %c0_9], %16 {strides = array<i32>} : memref<8x1xf32, #tpu.memory_space<vmem>>, vector<8x1xf32>,
    return
  }
  func.func @transform_0(%arg0: i32) -> (i32, i32) {
    %c0_i32 = arith.constant 0 : i32
    %c0_i32_0 = arith.constant 0 : i32
    return %arg0, %c0_i32 : i32, i32
  }
  func.func @transform_1(%arg0: i32) -> (i32, i32) {
    %c0_i32 = arith.constant 0 : i32
    %c0_i32_0 = arith.constant 0 : i32
    return %arg0, %c0_i32 : i32, i32
  }
  func.func @transform_2(%arg0: i32) -> (i32, i32) {
    %c0_i32 = arith.constant 0 : i32
    %c0_i32_0 = arith.constant 0 : i32
    %c0_i32_1 = arith.constant 0 : i32
    return %c0_i32, %c0_i32_0 : i32, i32
  }
  func.func @transform_3(%arg0: i32) -> (i32, i32) {
    %c0_i32 = arith.constant 0 : i32
    %c0_i32_0 = arith.constant 0 : i32
    return %arg0, %c0_i32 : i32, i32
  }
}

</mosaic_0001>

<bundles_post_ra>
// kernel: tpu_custom_call.1
= control target key start
LH: loop header
LB: loop body
LE: loop exit
PB: predicated region body
PF: predicated region fallthrough
CT: control target
= control target key end

     0   :  { %8 = vsyncpa [#allocation3], 0  ;;  %s115_s15 = smov [#allocation2]   ;;  %s116_s17 = smov 128   ;;  %s152_s0 = inlined_call_operand.vmem [shape: f32[8,32], index: 0, kind: input, shape index: {}]   ;;  %s153_s1 = inlined_call_operand.vmem [shape: s32[8,1], index: 1, kind: input, shape index: {}]   ;;  %s154_s2 = inlined_call_operand.hbm [shape: f32[16,32], index: 2, kind: input, shape index: {}]   ;;  %s155_s3 = inlined_call_operand.vmem [shape: f32[8,1], index: 3, kind: output, shape index: {}]  }
   0x1   :  { %s17_s14 = sshll.u32 %s154_s2, 4  ;;  %s19_s16 = sshll.u32 %s115_s15, 4  ;;  %s18_s14 = int_to_ptr.hbm [resolvable:$true] %s17_s14  ;;  %s20_s16 = int_to_ptr.vmem [resolvable:$true] %s19_s16 }
   0x2   :  { %s117_s18 = smov 8  }
   0x3   :  { %25 = dma.hbm_to_vmem [thread:$0]  %s18_s14, 256, %s20_s16, [#allocation3], %s116_s17, %s116_s17, %s117_s18  }
   0x4   :  { %113 = dma.done.wait [#allocation3], 256  }
   0x5   :  { %114 = vsyncadd [#allocation3], 4294967040  ;;  %v118_v0 = vmov 0   ;;  %v31_v1 = vld [vmem:[%s153_s1] sm:$0xff]  ;;  %v41_v2 = vld [vmem:[#allocation2 + $0x8] sm:$0xff]  ;;  %v32_v4 = vlaneseq  ;;  %vm42_vm0 = vcmask 130048  }
   0x6   :  { %88 = vset.pattern.permute.xlu0 %v118_v0  ;;  %60 = vmatpush.msra.mxu0 %v41_v2  ;;  %v40_v3 = vld [vmem:[#allocation2] sm:$0xff]  ;;  %v119_v7 = vmov 0.0   ;;  %vm68_vm2 = vcmask 261120   ;;  %vm74_vm3 = vcmask 7168  }
   0x7   :  { %35 = vperm.xlu0 %88, %v31_v1   ;;  %v33_v5 = vand.u32 127, %v32_v4  ;;  %v30_v9 = vld [vmem:[%s152_s0] sm:$0xff] }
   0x8   :  { %61 = vmatpush.msra.mxu0 %v40_v3 }
  0x79   :  { %v36_v6 = vpop.permute.xlu0 %35 }
  0x7a   :  { %vm37_vm1 = vcmp.eq.s32.totalorder %v36_v6, %v33_v5 }
  0x7b   :  { %v81_v8 = vsel %vm37_vm1, 1.0, %v119_v7 }
  0x7c   :  { %82 = vmatmul.msk.f32.vlgmr.msra.gmra.mxu0 %vm42_vm0, %v81_v8 }
  0xf9   :  { %v63_v10 = vpop.f32.mrf.mxu0 }
  0xfa   :  { %v66_v11 = vsub.f32 %v30_v9, %v63_v10 }
  0xfc   :  { %v67_v12 = vmul.f32 %v66_v11, %v66_v11 }
  0xfe   :  { %v69_v13 = vsel %vm68_vm2, %v67_v12, 0.0 }
  0xff   :  { %70 = vadd.xlane.f32.xlu0 %v69_v13 }
 0x172   :  { %v71_v14 = vpop.xlane.xlu0 %70 }
 0x173   :  { %v72_v15 = vmax.f32 %v71_v14, 1e-12 }
 0x175   :  { %v73_v16 = vmin.f32 %v72_v15, 1e+12 }
 0x177   :  { %75 = vst.msk [vmem:[%s155_s3] sm:$0xff] %vm74_vm3, %v73_v16 }
 0x178   :  { %80 = vsyncpa [#allocation3], 1 }

// kernel: tpu_custom_call.1
= control target key start
LH: loop header
LB: loop body
LE: loop exit
PB: predicated region body
PF: predicated region fallthrough
CT: control target
= control target key end

     0   :  { %8 = vsyncpa [#allocation3], 0  ;;  %s115_s15 = smov [#allocation2]   ;;  %s116_s17 = smov 128   ;;  %s152_s0 = inlined_call_operand.vmem [shape: f32[8,32], index: 0, kind: input, shape index: {}]   ;;  %s153_s1 = inlined_call_operand.vmem [shape: s32[8,1], index: 1, kind: input, shape index: {}]   ;;  %s154_s2 = inlined_call_operand.hbm [shape: f32[16,32], index: 2, kind: input, shape index: {}]   ;;  %s155_s3 = inlined_call_operand.vmem [shape: f32[8,1], index: 3, kind: output, shape index: {}]  }
   0x1   :  { %s17_s14 = sshll.u32 %s154_s2, 4  ;;  %s19_s16 = sshll.u32 %s115_s15, 4  ;;  %s18_s14 = int_to_ptr.hbm [resolvable:$true] %s17_s14  ;;  %s20_s16 = int_to_ptr.vmem [resolvable:$true] %s19_s16 }
   0x2   :  { %s117_s18 = smov 8  }
   0x3   :  { %25 = dma.hbm_to_vmem [thread:$0]  %s18_s14, 256, %s20_s16, [#allocation3], %s116_s17, %s116_s17, %s117_s18  }
   0x4   :  { %113 = dma.done.wait [#allocation3], 256  }
   0x5   :  { %114 = vsyncadd [#allocation3], 4294967040  ;;  %v118_v0 = vmov 0   ;;  %v31_v1 = vld [vmem:[%s153_s1] sm:$0xff]  ;;  %v41_v2 = vld [vmem:[#allocation2 + $0x8] sm:$0xff]  ;;  %v32_v4 = vlaneseq  ;;  %vm42_vm0 = vcmask 130048  }
   0x6   :  { %88 = vset.pattern.permute.xlu0 %v118_v0  ;;  %60 = vmatpush.msra.mxu0 %v41_v2  ;;  %v40_v3 = vld [vmem:[#allocation2] sm:$0xff]  ;;  %v119_v7 = vmov 0.0   ;;  %vm68_vm2 = vcmask 261120   ;;  %vm74_vm3 = vcmask 7168  }
   0x7   :  { %35 = vperm.xlu0 %88, %v31_v1   ;;  %v33_v5 = vand.u32 127, %v32_v4  ;;  %v30_v9 = vld [vmem:[%s152_s0] sm:$0xff] }
   0x8   :  { %61 = vmatpush.msra.mxu0 %v40_v3 }
  0x79   :  { %v36_v6 = vpop.permute.xlu0 %35 }
  0x7a   :  { %vm37_vm1 = vcmp.eq.s32.totalorder %v36_v6, %v33_v5 }
  0x7b   :  { %v81_v8 = vsel %vm37_vm1, 1.0, %v119_v7 }
  0x7c   :  { %82 = vmatmul.msk.f32.vlgmr.msra.gmra.mxu0 %vm42_vm0, %v81_v8 }
  0xf9   :  { %v63_v10 = vpop.f32.mrf.mxu0 }
  0xfa   :  { %v66_v11 = vsub.f32 %v30_v9, %v63_v10 }
  0xfc   :  { %v67_v12 = vmul.f32 %v66_v11, %v66_v11 }
  0xfe   :  { %v69_v13 = vsel %vm68_vm2, %v67_v12, 0.0 }
  0xff   :  { %70 = vadd.xlane.f32.xlu0 %v69_v13 }
 0x172   :  { %v71_v14 = vpop.xlane.xlu0 %70 }
 0x173   :  { %v72_v15 = vmax.f32 %v71_v14, 1e-12 }
 0x175   :  { %v73_v16 = vmin.f32 %v72_v15, 1e+12 }
 0x177   :  { %75 = vst.msk [vmem:[%s155_s3] sm:$0xff] %vm74_vm3, %v73_v16 }
 0x178   :  { %80 = vsyncpa [#allocation3], 1 }

</bundles_post_ra>
